<compile_context>
chip_gen: v6e
topology: v6e:2x2x1
jax: 0.10.0
libtpu: 0.0.40
codegen_flags: <defaults>
</compile_context>

<pallas_src>
import functools

import jax
import jax.numpy as jnp
from jax.experimental import pallas as pl
from jax.experimental.pallas import tpu as pltpu


def _profile_pooler_kernel(hid_ref, wm_ref, wx_ref, b_ref, g_ref, beta_ref,
                           o_ref, sum_sc, max_sc, *,
                           ln_eps, inv_t, block_t, seq_len, mask_t):
    t = pl.program_id(1)

    # --- init running reductions on the first sequence step -----------------
    @pl.when(t == 0)
    def _init():
        sum_sc[...] = jnp.zeros_like(sum_sc)
        max_sc[...] = jnp.full_like(max_sc, -jnp.inf)

    h = hid_ref[...]                                   # (bB, bT, H), source dtype

    if mask_t:
        # Last sequence block overhangs T: mask out-of-bounds rows so they
        # contribute 0 to the sum and -inf to the max.
        pos = t * block_t + jax.lax.broadcasted_iota(jnp.int32, (1, block_t, 1), 1)
        valid = pos < seq_len
        h_sum = jnp.where(valid, h, jnp.zeros_like(h))
        h_max = jnp.where(valid, h, jnp.full_like(h, -jnp.inf))
    else:
        h_sum = h
        h_max = h

    # f32 accumulation of the sequence reductions without materializing a full
    # f32 copy of the (bB, bT, H) tile.
    sum_sc[...] = sum_sc[...] + jnp.sum(h_sum, axis=1, dtype=jnp.float32)
    max_sc[...] = jnp.maximum(max_sc[...],
                              jnp.max(h_max, axis=1).astype(jnp.float32))

    # --- epilogue on the last sequence step ----------------------------------
    @pl.when(t == pl.num_programs(1) - 1)
    def _finalize():
        mean_pool = sum_sc[...] * jnp.float32(inv_t)          # (bB, H) f32
        max_pool = max_sc[...]                                # (bB, H) f32

        # Linear(2H -> D) with the concat eliminated:
        #   cat([mean, max]) @ W == mean @ W[:H] + max @ W[H:]
        y = jnp.dot(mean_pool.astype(wm_ref.dtype), wm_ref[...],
                    preferred_element_type=jnp.float32)
        y = y + jnp.dot(max_pool.astype(wx_ref.dtype), wx_ref[...],
                        preferred_element_type=jnp.float32)
        y = y + b_ref[...]                                    # (1, D) broadcast

        # ReLU
        y = jnp.maximum(y, 0.0)

        # LayerNorm over features (PyTorch semantics: biased variance,
        # eps inside the sqrt, affine gamma/beta).
        mu = jnp.mean(y, axis=-1, keepdims=True)
        var = jnp.mean(jnp.square(y - mu), axis=-1, keepdims=True)
        y = (y - mu) * jax.lax.rsqrt(var + jnp.float32(ln_eps))
        y = y * g_ref[...] + beta_ref[...]

        # TODO(synk): training-mode Dropout(p=0.1) (pltpu.prng_seed +
        # pltpu.prng_random_bits per output tile) not implemented; eval-mode
        # identity is used here.
        o_ref[...] = y.astype(o_ref.dtype)


def profile_encoder_pooler(hidden_states, weight, bias, gamma, beta, *,
                           ln_eps=1e-5, block_b=None, block_t=None,
                           param_dtype=None):
    """Pooler head of ProfileEncoder.

    hidden_states: (B, T, H)  -- BERT last_hidden_state (f32 or bf16)
    weight:        (2H, D)    -- nn.Linear(2H, d_model).weight.T (in-features first)
    bias:          (D,)
    gamma, beta:   (D,)       -- LayerNorm affine params
    returns:       (B, D) in hidden_states.dtype
    """
    B, T, H = hidden_states.shape
    two_h, D = weight.shape
    assert two_h == 2 * H, "weight must have shape (2*hidden_size, d_model)"

    # Matmul weights follow the activation dtype (bf16 hidden => bf16 weights,
    # halving resident VMEM and feeding the MXU at its native bf16 rate).
    # Accumulation stays f32 in the kernel.  Bias/LN params stay f32 (tiny).
    if param_dtype is None:
        param_dtype = hidden_states.dtype
    w_mean = weight[:H, :].astype(param_dtype)
    w_max = weight[H:, :].astype(param_dtype)
    bias2 = bias.reshape(1, D).astype(jnp.float32)
    gamma2 = gamma.reshape(1, D).astype(jnp.float32)
    beta2 = beta.reshape(1, D).astype(jnp.float32)

    hid_itemsize = jnp.dtype(hidden_states.dtype).itemsize
    w_itemsize = jnp.dtype(param_dtype).itemsize
    out_itemsize = hid_itemsize

    # Sequence tile: full T when short, otherwise 128 (sublane-aligned);
    # ragged last block is masked inside the kernel.
    if block_t is None:
        block_t = T if T <= 128 else 128
    block_t = min(block_t, T)

    # Generation-aware VMEM budgeting (v7x: 64 MiB/TC, v5e/v6e: 128 MiB).
    try:
        vmem_cap = int(pltpu.get_tpu_info().vmem_capacity_bytes)
    except Exception:
        vmem_cap = 64 * 1024 * 1024  # assume the tightest generation (v7x)

    def _vmem_need(bb):
        return (2 * (2 * H * D * w_itemsize)            # weight halves (dbl-buffered)
                + 2 * 3 * D * 4                         # bias/gamma/beta (f32)
                + 2 * bb * block_t * H * hid_itemsize   # hidden tile (dbl-buffered)
                + 2 * bb * H * 4                        # sum/max f32 scratch
                + 2 * bb * D * out_itemsize)            # output tile (dbl-buffered)

    budget = vmem_cap // 2                              # headroom for Mosaic temps
    b_cap = max(8, ((B + 7) // 8) * 8)                  # never tile past the batch
    if block_b is None:
        block_b = 8
        for cand in (256, 128, 64, 32, 16, 8):
            if cand <= b_cap and _vmem_need(cand) <= budget:
                block_b = cand
                break
    need = _vmem_need(block_b)
    vmem_limit = min(vmem_cap, max(32 * 1024 * 1024, int(need * 1.4) + (4 << 20)))

    grid = (pl.cdiv(B, block_b), pl.cdiv(T, block_t))
    mask_t = (T % block_t) != 0

    kernel = functools.partial(
        _profile_pooler_kernel,
        ln_eps=ln_eps, inv_t=1.0 / T, block_t=block_t, seq_len=T, mask_t=mask_t)

    cost = pl.CostEstimate(
        flops=4 * B * H * D,                # 2 * B * (2H) * D MACs
        transcendentals=B,                  # one rsqrt per row
        bytes_accessed=(B * T * H * hid_itemsize
                        + 2 * H * D * w_itemsize
                        + B * D * out_itemsize))

    return pl.pallas_call(
        kernel,
        out_shape=jax.ShapeDtypeStruct((B, D), hidden_states.dtype),
        grid_spec=pltpu.PrefetchScalarGridSpec(
            num_scalar_prefetch=0,
            grid=grid,
            in_specs=[
                # hidden states: tiled over (batch, seq), full H per block.
                pl.BlockSpec((block_b, block_t, H), lambda i, t: (i, t, 0)),
                # params: constant index_map -> resident in VMEM across steps.
                pl.BlockSpec((H, D), lambda i, t: (0, 0)),   # w_mean
                pl.BlockSpec((H, D), lambda i, t: (0, 0)),   # w_max
                pl.BlockSpec((1, D), lambda i, t: (0, 0)),   # bias
                pl.BlockSpec((1, D), lambda i, t: (0, 0)),   # gamma
                pl.BlockSpec((1, D), lambda i, t: (0, 0)),   # beta
            ],
            # Output block constant across the T axis -> resident accumulator;
            # written once on the last T step.
            out_specs=pl.BlockSpec((block_b, D), lambda i, t: (i, 0)),
            scratch_shapes=[
                pltpu.VMEM((block_b, H), jnp.float32),   # running sum
                pltpu.VMEM((block_b, H), jnp.float32),   # running max
            ],
        ),
        compiler_params=pltpu.CompilerParams(
            dimension_semantics=("parallel", "arbitrary"),
            vmem_limit_bytes=vmem_limit,
        ),
        cost_estimate=cost,
    )(hidden_states, w_mean, w_max, bias2, gamma2, beta2)


def _reference(hidden_states, weight, bias, gamma, beta, ln_eps=1e-5):
    """Pure-JAX reference matching the PyTorch forward (eval mode)."""
    h = hidden_states.astype(jnp.float32)
    mean_pool = h.mean(axis=1)
    max_pool = h.max(axis=1)
    combined = jnp.concatenate([mean_pool, max_pool], axis=1)
    y = combined @ weight.astype(jnp.float32) + bias
    y = jnp.maximum(y, 0.0)
    mu = y.mean(axis=-1, keepdims=True)
    var = jnp.square(y - mu).mean(axis=-1, keepdims=True)
    y = (y - mu) / jnp.sqrt(var + ln_eps)
    return y * gamma + beta


if __name__ == "__main__":
    key = jax.random.PRNGKey(0)
    k1, k2, k3, k4, k5, k6 = jax.random.split(key, 6)

    # Small shapes consistent with the module: batch=2, seq=8,
    # hidden_size=32 (BERT would be 768), d_model=32.
    B, T, H, D = 2, 8, 32, 32
    hidden_states = jax.random.normal(k1, (B, T, H), dtype=jnp.float32)
    weight = jax.random.normal(k2, (2 * H, D), dtype=jnp.float32) * 0.05
    bias = jax.random.normal(k3, (D,), dtype=jnp.float32) * 0.05
    gamma = 1.0 + 0.1 * jax.random.normal(k4, (D,), dtype=jnp.float32)
    beta = 0.1 * jax.random.normal(k5, (D,), dtype=jnp.float32)

    out = profile_encoder_pooler(hidden_states, weight, bias, gamma, beta)
    out = jax.block_until_ready(out)
    ref = _reference(hidden_states, weight, bias, gamma, beta)
    assert out.shape == (B, D), f"bad shape {out.shape}"
    assert jnp.allclose(out, ref, atol=1e-5, rtol=1e-5), "mismatch vs reference"

    # Ragged batch + ragged sequence tiles (exercises the masked T reduction
    # and the masked out-of-bounds output rows): B=5, T=19, forced block_t=8.
    B2, T2, H2, D2 = 5, 19, 128, 64
    h2 = jax.random.normal(k6, (B2, T2, H2), dtype=jnp.float32)
    w2 = jax.random.normal(k2, (2 * H2, D2), dtype=jnp.float32) * 0.05
    b2 = jax.random.normal(k3, (D2,), dtype=jnp.float32) * 0.05
    g2 = 1.0 + 0.1 * jax.random.normal(k4, (D2,), dtype=jnp.float32)
    be2 = 0.1 * jax.random.normal(k5, (D2,), dtype=jnp.float32)
    out2 = profile_encoder_pooler(h2, w2, b2, g2, be2, block_t=8)
    out2 = jax.block_until_ready(out2)
    ref2 = _reference(h2, w2, b2, g2, be2)
    assert out2.shape == (B2, D2), f"bad shape {out2.shape}"
    assert jnp.allclose(out2, ref2, atol=1e-4, rtol=1e-4), "ragged mismatch"

    print("KERNEL_OK")
</pallas_src>

<mosaic_0001>
module attributes {stable_mosaic.version = 11 : i64} {
  func.func @_profile_pooler_kernel(%arg0: i32, %arg1: i32, %arg2: memref<8x8x32xf32, #tpu.memory_space<vmem>>, %arg3: memref<32x32xf32, #tpu.memory_space<vmem>>, %arg4: memref<32x32xf32, #tpu.memory_space<vmem>>, %arg5: memref<1x32xf32, #tpu.memory_space<vmem>>, %arg6: memref<1x32xf32, #tpu.memory_space<vmem>>, %arg7: memref<1x32xf32, #tpu.memory_space<vmem>>, %arg8: memref<8x32xf32, #tpu.memory_space<vmem>>, %arg9: memref<8x32xf32, #tpu.memory_space<vmem>>, %arg10: memref<8x32xf32, #tpu.memory_space<vmem>>) attributes {dimension_semantics = [#tpu.dimension_semantics<parallel>, #tpu.dimension_semantics<arbitrary>], iteration_bounds = array<i64: 1, 1>, scalar_prefetch = 0 : i64, scratch_operands = 2 : i64, tpu.core_type = #tpu.core_type<tc>, window_params = [{transform_indices = @transform_0, window_bounds = array<i64: 8, 8, 32>}, {pipeline_mode = #tpu.pipeline_mode<synchronous>, transform_indices = @transform_1, window_bounds = array<i64: 32, 32>}, {pipeline_mode = #tpu.pipeline_mode<synchronous>, transform_indices = @transform_2, window_bounds = array<i64: 32, 32>}, {pipeline_mode = #tpu.pipeline_mode<synchronous>, transform_indices = @transform_3, window_bounds = array<i64: 1, 32>}, {pipeline_mode = #tpu.pipeline_mode<synchronous>, transform_indices = @transform_4, window_bounds = array<i64: 1, 32>}, {pipeline_mode = #tpu.pipeline_mode<synchronous>, transform_indices = @transform_5, window_bounds = array<i64: 1, 32>}, {transform_indices = @transform_6, window_bounds = array<i64: 8, 32>}]} {
    %c0_i32 = arith.constant 0 : i32
    %0 = arith.cmpi eq, %arg1, %c0_i32 : i32
    %1 = arith.extui %0 : i1 to i32
    %c0_i32_0 = arith.constant 0 : i32
    %2 = arith.cmpi ne, %1, %c0_i32_0 : i32
    scf.if %2 {
      %cst_14 = arith.constant 0.000000e+00 : f32
      %15 = vector.broadcast %cst_14 : f32 to vector<8x32xf32>
      %c0_15 = arith.constant 0 : index
      %c0_16 = arith.constant 0 : index
      %16 = vector.load %arg9[%c0_15, %c0_16] : memref<8x32xf32, #tpu.memory_space<vmem>>, vector<8x32xf32>
      tpu.vector_store %arg9[%c0_15, %c0_16], %15 {strides = array<i32>} : memref<8x32xf32, #tpu.memory_space<vmem>>, vector<8x32xf32>,
      %cst_17 = arith.constant 0xFF800000 : f32
      %17 = vector.broadcast %cst_17 : f32 to vector<8x32xf32>
      %c0_18 = arith.constant 0 : index
      %c0_19 = arith.constant 0 : index
      %18 = vector.load %arg10[%c0_18, %c0_19] : memref<8x32xf32, #tpu.memory_space<vmem>>, vector<8x32xf32>
      tpu.vector_store %arg10[%c0_18, %c0_19], %17 {strides = array<i32>} : memref<8x32xf32, #tpu.memory_space<vmem>>, vector<8x32xf32>,
    } else {
    }
    %c0 = arith.constant 0 : index
    %c0_1 = arith.constant 0 : index
    %c0_2 = arith.constant 0 : index
    %3 = vector.load %arg2[%c0, %c0_1, %c0_2] : memref<8x8x32xf32, #tpu.memory_space<vmem>>, vector<8x8x32xf32>
    %c0_3 = arith.constant 0 : index
    %c0_4 = arith.constant 0 : index
    %4 = vector.load %arg9[%c0_3, %c0_4] : memref<8x32xf32, #tpu.memory_space<vmem>>, vector<8x32xf32>
    %cst = arith.constant dense<0.000000e+00> : vector<8x32xf32>
    %5 = vector.multi_reduction <add>, %3, %cst [1] : vector<8x8x32xf32> to vector<8x32xf32>
    %6 = arith.addf %4, %5 : vector<8x32xf32>
    %c0_5 = arith.constant 0 : index
    %c0_6 = arith.constant 0 : index
    %7 = vector.load %arg9[%c0_5, %c0_6] : memref<8x32xf32, #tpu.memory_space<vmem>>, vector<8x32xf32>
    tpu.vector_store %arg9[%c0_5, %c0_6], %6 {strides = array<i32>} : memref<8x32xf32, #tpu.memory_space<vmem>>, vector<8x32xf32>,
    %c0_7 = arith.constant 0 : index
    %c0_8 = arith.constant 0 : index
    %8 = vector.load %arg10[%c0_7, %c0_8] : memref<8x32xf32, #tpu.memory_space<vmem>>, vector<8x32xf32>
    %cst_9 = arith.constant dense<0xFF800000> : vector<8x32xf32>
    %9 = vector.multi_reduction <maximumf>, %3, %cst_9 [1] : vector<8x8x32xf32> to vector<8x32xf32>
    %10 = arith.maximumf %8, %9 : vector<8x32xf32>
    %c0_10 = arith.constant 0 : index
    %c0_11 = arith.constant 0 : index
    %11 = vector.load %arg10[%c0_10, %c0_11] : memref<8x32xf32, #tpu.memory_space<vmem>>, vector<8x32xf32>
    tpu.vector_store %arg10[%c0_10, %c0_11], %10 {strides = array<i32>} : memref<8x32xf32, #tpu.memory_space<vmem>>, vector<8x32xf32>,
    %c0_i32_12 = arith.constant 0 : i32
    %12 = arith.cmpi eq, %arg1, %c0_i32_12 : i32
    %13 = arith.extui %12 : i1 to i32
    %c0_i32_13 = arith.constant 0 : i32
    %14 = arith.cmpi ne, %13, %c0_i32_13 : i32
    scf.if %14 {
      %c0_14 = arith.constant 0 : index
      %c0_15 = arith.constant 0 : index
      %15 = vector.load %arg9[%c0_14, %c0_15] : memref<8x32xf32, #tpu.memory_space<vmem>>, vector<8x32xf32>
      %cst_16 = arith.constant 1.250000e-01 : f32
      %16 = vector.broadcast %cst_16 : f32 to vector<8x32xf32>
      %17 = arith.mulf %15, %16 : vector<8x32xf32>
      %c0_17 = arith.constant 0 : index
      %c0_18 = arith.constant 0 : index
      %18 = vector.load %arg10[%c0_17, %c0_18] : memref<8x32xf32, #tpu.memory_space<vmem>>, vector<8x32xf32>
      %c0_19 = arith.constant 0 : index
      %c0_20 = arith.constant 0 : index
      %19 = vector.load %arg3[%c0_19, %c0_20] : memref<32x32xf32, #tpu.memory_space<vmem>>, vector<32x32xf32>
      %cst_21 = arith.constant dense<0.000000e+00> : vector<8x32xf32>
      %20 = tpu.matmul %17, %19, %cst_21 {dimension_numbers = #tpu.dot_dimension_numbers<[1], [0], [0], [1], [0, 0, 1, 1], [], []>} : vector<8x32xf32>, vector<32x32xf32>, vector<8x32xf32> -> vector<8x32xf32>
      %c0_22 = arith.constant 0 : index
      %c0_23 = arith.constant 0 : index
      %21 = vector.load %arg4[%c0_22, %c0_23] : memref<32x32xf32, #tpu.memory_space<vmem>>, vector<32x32xf32>
      %cst_24 = arith.constant dense<0.000000e+00> : vector<8x32xf32>
      %22 = tpu.matmul %18, %21, %cst_24 {dimension_numbers = #tpu.dot_dimension_numbers<[1], [0], [0], [1], [0, 0, 1, 1], [], []>} : vector<8x32xf32>, vector<32x32xf32>, vector<8x32xf32> -> vector<8x32xf32>
      %23 = arith.addf %20, %22 : vector<8x32xf32>
      %c0_25 = arith.constant 0 : index
      %c0_26 = arith.constant 0 : index
      %24 = vector.load %arg5[%c0_25, %c0_26] : memref<1x32xf32, #tpu.memory_space<vmem>>, vector<1x32xf32>
      %25 = vector.broadcast %24 : vector<1x32xf32> to vector<8x32xf32>
      %26 = arith.addf %23, %25 : vector<8x32xf32>
      %cst_27 = arith.constant 0.000000e+00 : f32
      %27 = vector.broadcast %cst_27 : f32 to vector<8x32xf32>
      %28 = arith.maximumf %26, %27 : vector<8x32xf32>
      %cst_28 = arith.constant dense<0.000000e+00> : vector<8xf32>
      %29 = vector.multi_reduction <add>, %28, %cst_28 [1] : vector<8x32xf32> to vector<8xf32>
      %30 = vector.shape_cast %29 : vector<8xf32> to vector<8x1xf32>
      %cst_29 = arith.constant 3.200000e+01 : f32
      %31 = vector.broadcast %cst_29 : f32 to vector<8x1xf32>
      %32 = arith.divf %30, %31 : vector<8x1xf32>
      %33 = vector.broadcast %32 : vector<8x1xf32> to vector<8x32xf32>
      %34 = arith.subf %28, %33 : vector<8x32xf32>
      %35 = arith.mulf %34, %34 : vector<8x32xf32>
      %cst_30 = arith.constant dense<0.000000e+00> : vector<8xf32>
      %36 = vector.multi_reduction <add>, %35, %cst_30 [1] : vector<8x32xf32> to vector<8xf32>
      %37 = vector.shape_cast %36 : vector<8xf32> to vector<8x1xf32>
      %cst_31 = arith.constant 3.200000e+01 : f32
      %38 = vector.broadcast %cst_31 : f32 to vector<8x1xf32>
      %39 = arith.divf %37, %38 : vector<8x1xf32>
      %40 = vector.broadcast %32 : vector<8x1xf32> to vector<8x32xf32>
      %41 = arith.subf %28, %40 : vector<8x32xf32>
      %cst_32 = arith.constant 9.99999974E-6 : f32
      %42 = vector.broadcast %cst_32 : f32 to vector<8x1xf32>
      %43 = arith.addf %39, %42 : vector<8x1xf32>
      %44 = math.rsqrt %43 : vector<8x1xf32>
      %45 = vector.broadcast %44 : vector<8x1xf32> to vector<8x32xf32>
      %46 = arith.mulf %41, %45 : vector<8x32xf32>
      %c0_33 = arith.constant 0 : index
      %c0_34 = arith.constant 0 : index
      %47 = vector.load %arg6[%c0_33, %c0_34] : memref<1x32xf32, #tpu.memory_space<vmem>>, vector<1x32xf32>
      %48 = vector.broadcast %47 : vector<1x32xf32> to vector<8x32xf32>
      %49 = arith.mulf %46, %48 : vector<8x32xf32>
      %c0_35 = arith.constant 0 : index
      %c0_36 = arith.constant 0 : index
      %50 = vector.load %arg7[%c0_35, %c0_36] : memref<1x32xf32, #tpu.memory_space<vmem>>, vector<1x32xf32>
      %51 = vector.broadcast %50 : vector<1x32xf32> to vector<8x32xf32>
      %52 = arith.addf %49, %51 : vector<8x32xf32>
      %c0_37 = arith.constant 0 : index
      %c0_38 = arith.constant 0 : index
      %53 = vector.load %arg8[%c0_37, %c0_38] : memref<8x32xf32, #tpu.memory_space<vmem>>, vector<8x32xf32>
      tpu.vector_store %arg8[%c0_37, %c0_38], %52 {strides = array<i32>} : memref<8x32xf32, #tpu.memory_space<vmem>>, vector<8x32xf32>,
    } else {
    }
    return
  }
  func.func @transform_0(%arg0: i32, %arg1: i32) -> (i32, i32, i32) {
    %c0_i32 = arith.constant 0 : i32
    %c0_i32_0 = arith.constant 0 : i32
    return %arg0, %arg1, %c0_i32 : i32, i32, i32
  }
  func.func @transform_1(%arg0: i32, %arg1: i32) -> (i32, i32) {
    %c0_i32 = arith.constant 0 : i32
    %c0_i32_0 = arith.constant 0 : i32
    %c0_i32_1 = arith.constant 0 : i32
    return %c0_i32, %c0_i32_0 : i32, i32
  }
  func.func @transform_2(%arg0: i32, %arg1: i32) -> (i32, i32) {
    %c0_i32 = arith.constant 0 : i32
    %c0_i32_0 = arith.constant 0 : i32
    %c0_i32_1 = arith.constant 0 : i32
    return %c0_i32, %c0_i32_0 : i32, i32
  }
  func.func @transform_3(%arg0: i32, %arg1: i32) -> (i32, i32) {
    %c0_i32 = arith.constant 0 : i32
    %c0_i32_0 = arith.constant 0 : i32
    %c0_i32_1 = arith.constant 0 : i32
    return %c0_i32, %c0_i32_0 : i32, i32
  }
  func.func @transform_4(%arg0: i32, %arg1: i32) -> (i32, i32) {
    %c0_i32 = arith.constant 0 : i32
    %c0_i32_0 = arith.constant 0 : i32
    %c0_i32_1 = arith.constant 0 : i32
    return %c0_i32, %c0_i32_0 : i32, i32
  }
  func.func @transform_5(%arg0: i32, %arg1: i32) -> (i32, i32) {
    %c0_i32 = arith.constant 0 : i32
    %c0_i32_0 = arith.constant 0 : i32
    %c0_i32_1 = arith.constant 0 : i32
    return %c0_i32, %c0_i32_0 : i32, i32
  }
  func.func @transform_6(%arg0: i32, %arg1: i32) -> (i32, i32) {
    %c0_i32 = arith.constant 0 : i32
    %c0_i32_0 = arith.constant 0 : i32
    return %arg0, %c0_i32 : i32, i32
  }
}

</mosaic_0001>

<bundles_post_ra>
// kernel: tpu_custom_call.1
= control target key start
LH: loop header
LB: loop body
LE: loop exit
PB: predicated region body
PF: predicated region fallthrough
CT: control target
= control target key end

     0   :  { %11 = vsyncpa [#allocation5], 0  ;;  %s730_s0 = inlined_call_operand.hbm [shape: f32[2,8,32], index: 0, kind: input, shape index: {}]   ;;  %s731_s1 = inlined_call_operand.hbm [shape: f32[32,32], index: 1, kind: input, shape index: {}]   ;;  %s732_s2 = inlined_call_operand.hbm [shape: f32[32,32], index: 2, kind: input, shape index: {}]   ;;  %s733_s3 = inlined_call_operand.vmem [shape: f32[1,32], index: 3, kind: input, shape index: {}]   ;;  %s734_s4 = inlined_call_operand.vmem [shape: f32[1,32], index: 4, kind: input, shape index: {}]   ;;  %s735_s5 = inlined_call_operand.vmem [shape: f32[1,32], index: 5, kind: input, shape index: {}]   ;;  %s736_s6 = inlined_call_operand.hbm [shape: f32[2,32], index: 6, kind: output, shape index: {}]  }
   0x1   :  { %12 = vsyncpa [#allocation8], 0 }
   0x2   :  { %13 = vsyncpa [#allocation6], 0 }
   0x3   :  { %18 = vsyncadd [#allocation5], 768  ;;  %s592_s21 = smov [#allocation7]   ;;  %s593_s23 = smov [#allocation4]  }
   0x4   :  { %s31_s22 = sshll.u32 %s592_s21, 4  ;;  %s19_s24 = sshll.u32 %s593_s23, 4  ;;  %s32_s22 = int_to_ptr.vmem [resolvable:$true] %s31_s22  ;;  %s20_s24 = int_to_ptr.vmem [resolvable:$true] %s19_s24 }
   0x5   :  { %s514_s25 = scalar_lea.vmem %s32_s22, 512  ;;  %p519_p1 = scmp.lt.s32.totalorder %s32_s22, %s32_s22 }
   0x6   :  { %p515_p0 = scmp.ne.s32.totalorder %s32_s22, %s514_s25  ;;  %p520_p2 = scmp.lt.s32.totalorder %s514_s25, %s514_s25 }
   0x8   :  { %p521_p3 = por %p520_p2, %p519_p1 }
   0xa   :  { %p522_p4 = pnand %p521_p3, %p515_p0 }
   0xc   :  { %525 = shalt.err (!%p522_p4)
}
   0xd   :  { %s594_s26 = smov 128   ;;  %s595_s27 = smov 8  }
   0xe   :  { %37 = dma.hbm_to_vmem [thread:$0]  %s731_s1, 512, %s32_s22, [#allocation8], %s594_s26, %s594_s26, %s595_s27  }
   0xf   :  { %s534_s30 = scalar_lea.vmem %s20_s24, 256  ;;  %s538_s7 = scalar_lea.vmem %s20_s24, 1024 }
  0x10   :  { %p535_p5 = scmp.ne.s32.totalorder %s20_s24, %s534_s30  ;;  %p539_p6 = scmp.lt.s32.totalorder %s20_s24, %s20_s24 }
  0x11   :  { %p540_p7 = scmp.lt.s32.totalorder %s538_s7, %s534_s30 }
  0x13   :  { %p541_p8 = por %p540_p7, %p539_p6 }
  0x15   :  { %p542_p9 = pnand %p541_p8, %p535_p5 }
  0x17   :  { %545 = shalt.err (!%p542_p9)
}
  0x18   :  { %25 = dma.hbm_to_vmem [thread:$0]  %s730_s0, 256, %s20_s24, [#allocation5], %s594_s26, %s594_s26, %s595_s27  }
  0x19   :  { %s596_s10 = smov [#allocation9]  }
  0x1a   :  { %s43_s11 = sshll.u32 %s596_s10, 4  ;;  %s44_s11 = int_to_ptr.vmem [resolvable:$true] %s43_s11 }
  0x1b   :  { %s554_s12 = scalar_lea.vmem %s44_s11, 512  ;;  %p559_p11 = scmp.lt.s32.totalorder %s44_s11, %s44_s11 }
  0x1c   :  { %p555_p10 = scmp.ne.s32.totalorder %s44_s11, %s554_s12  ;;  %p560_p12 = scmp.lt.s32.totalorder %s554_s12, %s554_s12 }
  0x1e   :  { %p561_p13 = por %p560_p12, %p559_p11 }
  0x20   :  { %p562_p0 = pnand %p561_p13, %p555_p10 }
  0x22   :  { %565 = shalt.err (!%p562_p0)
}
  0x23   :  { %49 = dma.hbm_to_vmem [thread:$0]  %s732_s2, 512, %s44_s11, [#allocation8], %s594_s26, %s594_s26, %s595_s27  }
  0x24   :  { %586 = dma.done.wait [#allocation5], 1024  }
  0x25   :  { %587 = vsyncadd [#allocation5], 4294966272 }
  0x26   :  { %588 = dma.done.wait [#allocation8], 1024  }
  0x27   :  { %589 = vsyncadd [#allocation8], 4294966272  ;;  %vm69_vm0 = vcmask 261120   ;;  %v597_v0 = vmov 0.0   ;;  %v598_v1 = vmov -inf   ;;  %vm599_vm1 = vmmov 0  }
  0x28   :  { %471 = vmatprep.subr.mxu0 %v597_v0  ;;  %482 = vmatprep.subr.mxu1 %v597_v0  ;;  %71 = vst.msk [vmem:[#allocation3] sm:$0xff] %vm69_vm0, %v598_v1  ;;  %70 = vst.msk [vmem:[#allocation2] sm:$0xff] %vm69_vm0, %v597_v0  ;;  %v251_v2 = vld [vmem:[#allocation9 + $0x18] sm:$0xff]  ;;  %v250_v3 = vld [vmem:[#allocation9 + $0x10] sm:$0xff]  ;;  %vm146_vm2 = vcmask 1041409   ;;  %vm148_vm3 = vcmask 1042434  }
  0x29   :  { %479 = vmatprep.mubr.msk.f32.mxu0 %vm599_vm1, %v597_v0  ;;  %490 = vmatprep.mubr.msk.f32.mxu1 %vm599_vm1, %v597_v0  ;;  %v247_v4 = vld [vmem:[#allocation7 + $0x18] sm:$0xff]  ;;  %v249_v5 = vld [vmem:[#allocation9 + $0x8] sm:$0xff]  ;;  %v246_v6 = vld [vmem:[#allocation7 + $0x10] sm:$0xff]  ;;  %vm150_vm4 = vcmask 1043459   ;;  %vm152_vm5 = vcmask 1044484   ;;  %vm154_vm6 = vcmask 1045509  }
  0x2a   :  { %472 = vmatpush3.msra.mxu0 %v251_v2  ;;  %483 = vmatpush3.msra.mxu1 %v247_v4  ;;  %v248_v7 = vld [vmem:[#allocation9] sm:$0xff]  ;;  %v245_v8 = vld [vmem:[#allocation7 + $0x8] sm:$0xff]  ;;  %v74_v11 = vld [vmem:[#allocation4 + $0x10] sm:$0xff]  ;;  %vm156_vm7 = vcmask 1046534   ;;  %vm158_vm8 = vcmask 1047559  }
  0x2b   :  { %473 = vmatprep.subr.mxu0 %v597_v0  ;;  %484 = vmatprep.subr.mxu1 %v597_v0  ;;  %v72_v9 = vld [vmem:[#allocation4] sm:$0xff]  ;;  %v73_v10 = vld [vmem:[#allocation4 + $0x8] sm:$0xff]  ;;  %v75_v12 = vld [vmem:[#allocation4 + $0x18] sm:$0xff]  ;;  %v96_v22 = vsel %vm69_vm0, %v74_v11, 0.0  ;;  %v178_v43 = vsel %vm69_vm0, %v74_v11, -inf }
  0x2c   :  { %474 = vmatpush3.msra.mxu0 %v250_v3  ;;  %485 = vmatpush3.msra.mxu1 %v246_v6  ;;  %v76_v13 = vld [vmem:[#allocation4 + $0x20] sm:$0xff]  ;;  %v82_v14 = vsel %vm69_vm0, %v72_v9, 0.0  ;;  %v89_v15 = vsel %vm69_vm0, %v73_v10, 0.0  ;;  %v164_v16 = vsel %vm69_vm0, %v72_v9, -inf  ;;  %v77_v17 = vld [vmem:[#allocation4 + $0x28] sm:$0xff]  ;;  %v78_v18 = vld [vmem:[#allocation4 + $0x30] sm:$0xff] }
  0x2d   :  { %475 = vmatprep.subr.mxu0 %v597_v0  ;;  %486 = vmatprep.subr.mxu1 %v597_v0  ;;  %v79_v19 = vld [vmem:[#allocation4 + $0x38] sm:$0xff]  ;;  %v83_v20 = vrot.slane %v82_v14, 4  ;;  %v90_v21 = vrot.slane %v89_v15, 4  ;;  %v97_v23 = vrot.slane %v96_v22, 4  ;;  %v103_v24 = vsel %vm69_vm0, %v75_v12, 0.0  ;;  %v244_v27 = vld [vmem:[#allocation7] sm:$0xff] }
  0x2e   :  { %476 = vmatpush3.msra.mxu0 %v249_v5  ;;  %487 = vmatpush3.msra.mxu1 %v245_v8  ;;  %v110_v25 = vsel %vm69_vm0, %v76_v13, 0.0  ;;  %v117_v26 = vsel %vm69_vm0, %v77_v17, 0.0  ;;  %v104_v30 = vrot.slane %v103_v24, 4  ;;  %v124_v34 = vsel %vm69_vm0, %v78_v18, 0.0 }
  0x2f   :  { %477 = vmatprep.subr.mxu0 %v597_v0  ;;  %v656_v28 = vadd.f32 %v83_v20, %v82_v14  ;;  %v658_v29 = vadd.f32 %v90_v21, %v89_v15  ;;  %v111_v31 = vrot.slane %v110_v25, 4  ;;  %488 = vmatprep.subr.mxu1 %v597_v0  ;;  %v660_v32 = vadd.f32 %v97_v23, %v96_v22 }
  0x30   :  { %478 = vmatpush3.msra.mxu0 %v248_v7  ;;  %v118_v33 = vrot.slane %v117_v26, 4  ;;  %v131_v35 = vsel %vm69_vm0, %v79_v19, 0.0  ;;  %489 = vmatpush3.msra.mxu1 %v244_v27  ;;  %v664_v36 = vadd.f32 %v104_v30, %v103_v24  ;;  %v125_v38 = vrot.slane %v124_v34, 4 }
  0x31   :  { %v666_v37 = vadd.f32 %v111_v31, %v110_v25  ;;  %v132_v39 = vrot.slane %v131_v35, 4  ;;  %v165_v41 = vrot.slane %v164_v16, 4  ;;  %v171_v42 = vsel %vm69_vm0, %v73_v10, -inf }
  0x32   :  { %v668_v40 = vadd.f32 %v118_v33, %v117_v26  ;;  %v672_v44 = vadd.f32 %v125_v38, %v124_v34  ;;  %v172_v46 = vrot.slane %v171_v42, 4  ;;  %v179_v47 = vrot.slane %v178_v43, 4 }
  0x33   :  { %v674_v45 = vadd.f32 %v132_v39, %v131_v35  ;;  %v166_v48 = vmax.f32 %v164_v16, %v165_v41  ;;  %v185_v49 = vsel %vm69_vm0, %v75_v12, -inf  ;;  %v192_v50 = vsel %vm69_vm0, %v76_v13, -inf }
  0x34   :  { %v199_v51 = vsel %vm69_vm0, %v77_v17, -inf  ;;  %v173_v52 = vmax.f32 %v171_v42, %v172_v46  ;;  %v180_v53 = vmax.f32 %v178_v43, %v179_v47  ;;  %v186_v54 = vrot.slane %v185_v49, 4 }
  0x35   :  { %v193_v55 = vrot.slane %v192_v50, 4  ;;  %v167_v56 = vrot.slane %v166_v48, 2  ;;  %v200_v57 = vrot.slane %v199_v51, 4  ;;  %v206_v58 = vsel %vm69_vm0, %v78_v18, -inf }
  0x36   :  { %v213_v59 = vsel %vm69_vm0, %v79_v19, -inf  ;;  %v174_v60 = vrot.slane %v173_v52, 2  ;;  %v181_v61 = vrot.slane %v180_v53, 2  ;;  %v187_v62 = vmax.f32 %v185_v49, %v186_v54 }
  0x37   :  { %v194_v63 = vmax.f32 %v192_v50, %v193_v55  ;;  %v168_v0 = vmax.f32 %v166_v48, %v167_v56  ;;  %v201_v1 = vmax.f32 %v199_v51, %v200_v57  ;;  %v207_v2 = vrot.slane %v206_v58, 4 }
  0x38   :  { %v214_v3 = vrot.slane %v213_v59, 4  ;;  %v175_v4 = vmax.f32 %v173_v52, %v174_v60  ;;  %v182_v5 = vmax.f32 %v180_v53, %v181_v61  ;;  %v188_v6 = vrot.slane %v187_v62, 2  ;;  %v163_v52 = vld [vmem:[#allocation3] sm:$0xff] }
  0x39   :  { %v195_v7 = vrot.slane %v194_v63, 2  ;;  %v169_v8 = vrot.slane %v168_v0, 1  ;;  %v202_v9 = vrot.slane %v201_v1, 2  ;;  %v208_v10 = vmax.f32 %v206_v58, %v207_v2 }
  0x3a   :  { %v215_v11 = vmax.f32 %v213_v59, %v214_v3  ;;  %v176_v12 = vrot.slane %v175_v4, 1  ;;  %v183_v13 = vrot.slane %v182_v5, 1  ;;  %v189_v14 = vmax.f32 %v187_v62, %v188_v6 }
  0x3b   :  { %v196_v15 = vmax.f32 %v194_v63, %v195_v7  ;;  %v170_v16 = vmax.f32 %v168_v0, %v169_v8  ;;  %v203_v17 = vmax.f32 %v201_v1, %v202_v9  ;;  %v209_v18 = vrot.slane %v208_v10, 2 }
  0x3c   :  { %v216_v19 = vrot.slane %v215_v11, 2  ;;  %v177_v20 = vmax.f32 %v175_v4, %v176_v12  ;;  %v184_v21 = vmax.f32 %v182_v5, %v183_v13  ;;  %v190_v22 = vrot.slane %v189_v14, 1 }
  0x3d   :  { %v197_v23 = vrot.slane %v196_v15, 1  ;;  %v204_v24 = vrot.slane %v203_v17, 1  ;;  %v210_v25 = vmax.f32 %v208_v10, %v209_v18  ;;  %v85_v27 = vrot.slane %v656_v28, 2  ;;  %v80_v18 = vld [vmem:[#allocation2] sm:$0xff] }
  0x3e   :  { %v217_v26 = vmax.f32 %v215_v11, %v216_v19  ;;  %v191_v30 = vmax.f32 %v189_v14, %v190_v22  ;;  %v228_v33 = vsel %vm146_vm2, %v177_v20, %v170_v16  ;;  %v92_v34 = vrot.slane %v658_v29, 2 }
  0x3f   :  { %v198_v31 = vmax.f32 %v196_v15, %v197_v23  ;;  %v205_v35 = vmax.f32 %v203_v17, %v204_v24  ;;  %v211_v38 = vrot.slane %v210_v25, 1  ;;  %v229_v41 = vsel %vm148_vm3, %v184_v21, %v228_v33 }
  0x40   :  { %v218_v39 = vrot.slane %v217_v26, 1  ;;  %v230_v42 = vsel %vm150_vm4, %v191_v30, %v229_v41  ;;  %v86_v43 = vadd.f32 %v85_v27, %v656_v28  ;;  %v93_v46 = vadd.f32 %v92_v34, %v658_v29 }
  0x41   :  { %v99_v47 = vrot.slane %v660_v32, 2  ;;  %v212_v48 = vmax.f32 %v210_v25, %v211_v38  ;;  %v231_v50 = vsel %vm152_vm5, %v198_v31, %v230_v42  ;;  %v106_v51 = vrot.slane %v664_v36, 2 }
  0x42   :  { %v219_v49 = vmax.f32 %v217_v26, %v218_v39  ;;  %v232_v53 = vsel %vm154_vm6, %v205_v35, %v231_v50  ;;  %v87_v54 = vrot.slane %v86_v43, 1  ;;  %v94_v55 = vrot.slane %v93_v46, 1  ;;  %v458_v26 = vld [vmem:[%s733_s3] ss:$0 sm:$0xff] }
  0x43   :  { %v100_v56 = vadd.f32 %v99_v47, %v660_v32  ;;  %v233_v57 = vsel %vm156_vm7, %v212_v48, %v232_v53  ;;  %v107_v28 = vadd.f32 %v106_v51, %v664_v36  ;;  %v113_v29 = vrot.slane %v666_v37, 2  ;;  %v460_v51 = vld [vmem:[%s735_s5] ss:$0 sm:$0xff] }
  0x44   :  { %v120_v58 = vrot.slane %v668_v40, 2  ;;  %v234_v59 = vsel %vm158_vm8, %v219_v49, %v233_v57  ;;  %v88_v60 = vadd.f32 %v87_v54, %v86_v43  ;;  %v95_v61 = vadd.f32 %v94_v55, %v93_v46  ;;  %v459_v49 = vld [vmem:[%s734_s4] ss:$0 sm:$0xff] }
  0x45   :  { %v101_v62 = vrot.slane %v100_v56, 1  ;;  %v236_v63 = vmax.f32 %v163_v52, %v234_v59  ;;  %v108_v0 = vrot.slane %v107_v28, 1  ;;  %v114_v1 = vadd.f32 %v113_v29, %v666_v37 }
  0x46   :  { %v121_v2 = vadd.f32 %v120_v58, %v668_v40  ;;  %v127_v3 = vrot.slane %v672_v44, 2  ;;  %v134_v36 = vrot.slane %v674_v45, 2  ;;  %v147_v4 = vsel %vm146_vm2, %v95_v61, %v88_v60 }
  0x47   :  { %v102_v32 = vadd.f32 %v101_v62, %v100_v56  ;;  %237 = vst.msk [vmem:[#allocation3] sm:$0xff] %vm69_vm0, %v236_v63  ;;  %v109_v5 = vadd.f32 %v108_v0, %v107_v28  ;;  %v115_v6 = vrot.slane %v114_v1, 1 }
  0x48   :  { %v122_v7 = vrot.slane %v121_v2, 1  ;;  %v128_v8 = vadd.f32 %v127_v3, %v672_v44  ;;  %v135_v9 = vadd.f32 %v134_v36, %v674_v45 }
  0x49   :  { %v149_v37 = vsel %vm148_vm3, %v102_v32, %v147_v4  ;;  %v116_v10 = vadd.f32 %v115_v6, %v114_v1 }
  0x4a   :  { %v123_v40 = vadd.f32 %v122_v7, %v121_v2  ;;  %v151_v11 = vsel %vm150_vm4, %v109_v5, %v149_v37  ;;  %v129_v12 = vrot.slane %v128_v8, 1  ;;  %v136_v13 = vrot.slane %v135_v9, 1 }
  0x4b   :  { %v153_v14 = vsel %vm152_vm5, %v116_v10, %v151_v11 }
  0x4c   :  { %v130_v15 = vadd.f32 %v129_v12, %v128_v8  ;;  %v137_v16 = vadd.f32 %v136_v13, %v135_v9  ;;  %v155_v17 = vsel %vm154_vm6, %v123_v40, %v153_v14 }
  0x4e   :  { %v243_v19 = vld [vmem:[#allocation3] sm:$0xff]  ;;  %v157_v44 = vsel %vm156_vm7, %v130_v15, %v155_v17 }
  0x4f   :  { %480 = vmatmul.mubr.msk.f32.vlgmr.msra.gmra.mxu0 %vm69_vm0, %v243_v19  ;;  %v159_v45 = vsel %vm158_vm8, %v137_v16, %v157_v44 }
  0x50   :  { %v161_v20 = vadd.f32 %v159_v45, %v80_v18 }
  0x52   :  { %162 = vst.msk [vmem:[#allocation2] sm:$0xff] %vm69_vm0, %v161_v20 }
  0x59   :  { %v241_v21 = vld [vmem:[#allocation2] sm:$0xff] }
  0x5a   :  { %v242_v22 = vmul.f32 0.125, %v241_v21 }
  0x5c   :  { %491 = vmatmul.mubr.msk.f32.vlgmr.msra.gmra.mxu1 %vm69_vm0, %v242_v22 }
 0x10f   :  { %v321_v23 = vpop.f32.mrf.mxu0 }
 0x111   :  { %v481_v24 = vpop.f32.mrf.mxu0 }
 0x11c   :  { %v394_v25 = vpop.f32.mrf.mxu1 }
 0x11d   :  { %v395_v27 = vadd.f32 %v394_v25, %v321_v23 }
 0x11e   :  { %v492_v30 = vpop.f32.mrf.mxu1 }
 0x11f   :  { %v405_v31 = vadd.f32 %v458_v26, %v395_v27 }
 0x121   :  { %v406_v33 = vmax.f32 %v405_v31, 0.0 }
 0x123   :  { %v407_v34 = vsel %vm69_vm0, %v406_v33, 0.0 }
 0x124   :  { %408 = vadd.xlane.f32.xlu0 %v407_v34 }
 0x1ad   :  { %v409_v35 = vpop.xlane.xlu0 %408 }
 0x1ae   :  { %v411_v38 = vmul.f32 0.03125, %v409_v35 }
 0x1b0   :  { %v412_v39 = vsub.f32 %v406_v33, %v411_v38 }
 0x1b2   :  { %v413_v41 = vmul.f32 %v412_v39, %v412_v39 }
 0x1b4   :  { %v414_v42 = vsel %vm69_vm0, %v413_v41, 0.0 }
 0x1b5   :  { %415 = vadd.xlane.f32.xlu0 %v414_v42 }
 0x23e   :  { %v416_v43 = vpop.xlane.xlu0 %415 }
 0x23f   :  { %v417_v46 = vmul.f32 0.03125, %v416_v43 }
 0x241   :  { %v418_v47 = vadd.f32 1e-05, %v417_v46 }
 0x243   :  { %504 = vrsqrt.f32 %v418_v47 }
 0x250   :  { %v505_v48 = vpop.eup %504 }
 0x251   :  { %v420_v50 = vmul.f32 %v505_v48, %v412_v39 }
 0x253   :  { %v428_v52 = vmul.f32 %v459_v49, %v420_v50 }
 0x255   :  { %v436_v53 = vadd.f32 %v460_v51, %v428_v52 }
 0x257   :  { %437 = vst.msk [vmem:[#allocation10] sm:$0xff] %vm69_vm0, %v436_v53 }
 0x258   :  { %442 = vsyncadd [#allocation6], 96  ;;  %s600_s17 = smov [#allocation10]  }
 0x259   :  { %s443_s18 = sshll.u32 %s600_s17, 4  ;;  %s444_s18 = int_to_ptr.vmem [resolvable:$true] %s443_s18 }
 0x25a   :  { %s566_s19 = scalar_lea.vmem %s444_s18, 32  ;;  %s570_s20 = scalar_lea.vmem %s444_s18, 128 }
 0x25b   :  { %p567_p1 = scmp.ne.s32.totalorder %s444_s18, %s566_s19  ;;  %p571_p2 = scmp.lt.s32.totalorder %s444_s18, %s444_s18 }
 0x25c   :  { %p572_p3 = scmp.lt.s32.totalorder %s570_s20, %s566_s19 }
 0x25e   :  { %p573_p4 = por %p572_p3, %p571_p2 }
 0x260   :  { %p574_p5 = pnand %p573_p4, %p567_p1 }
 0x262   :  { %577 = shalt.err (!%p574_p5)
}
 0x263   :  { %s601_s4 = smov 32   ;;  %s602_s21 = smov 2  }
 0x264   :  { %449 = dma.vmem_to_hbm [thread:$0]  %s444_s18, 32, %s736_s6, [#allocation6], %s601_s4, %s601_s4, %s602_s21  }
 0x265   :  { %590 = dma.done.wait [#allocation6], 128  }
 0x266   :  { %591 = vsyncadd [#allocation6], 4294967168 }
 0x267   :  { %453 = vsyncpa [#allocation5], 1 }
 0x268   :  { %454 = vsyncpa [#allocation8], 1 }
 0x269   :  { %455 = vsyncpa [#allocation6], 1 }

</bundles_post_ra>
